<compile_context>
chip_gen: v6e
topology: v6e:2x2x1
jax: 0.10.0
libtpu: 0.0.40
codegen_flags: <defaults>
</compile_context>

<pallas_src>
import jax
import jax.numpy as jnp
from jax import lax
from jax.experimental import pallas as pl
from jax.experimental.pallas import tpu as pltpu

T = 0.5  # temperature, fixed in the PyTorch forward


def _disc2_kernel(h_aug_ref, h_pos_ref, loss_ref):
    # Whole (B, n_h) operands resident in VMEM; scalar loss written to SMEM.
    # Element-wise math is kept in f32 (v5e's VPU/EUP have no bf16 path).
    ha = h_aug_ref[...].astype(jnp.float32)          # (B, n_h)
    hp = h_pos_ref[...].astype(jnp.float32)          # (B, n_h)

    # Pre-normalize the rows (rsqrt -> EUP slot) and fold 1/T into the lhs so
    # the (B,B) sim matrix needs no post-hoc divide and no norm transpose.
    inv_a = lax.rsqrt(jnp.sum(ha * ha, axis=1, keepdims=True))   # (B, 1)
    inv_p = lax.rsqrt(jnp.sum(hp * hp, axis=1, keepdims=True))   # (B, 1)
    ha_n = ha * (inv_a * (1.0 / T))                              # (B, n_h)
    hp_n = hp * inv_p                                            # (B, n_h)

    # einsum('ik,jk->ij') on the MXU without materializing hp_n^T.
    sim = jnp.exp(
        lax.dot_general(
            ha_n, hp_n,
            dimension_numbers=(((1,), (1,)), ((), ())),
            preferred_element_type=jnp.float32,
        )
    )                                                            # (B, B)

    # Diagonal computed directly from the normalized operands: one VPU multiply
    # + one lane-axis reduce, instead of iota/mask/select over (B,B).
    pos_sim = jnp.exp(jnp.sum(ha_n * hp_n, axis=1, keepdims=True))  # (B, 1)

    rowsum = jnp.sum(sim, axis=1, keepdims=True)                    # (B, 1)

    # torch broadcasting: pos_sub[i, j] = rowsum[i] - pos_sim[j]
    pos_sub = rowsum - pos_sim.T                                    # (B, B)

    # mean_{i,j} -log(pos_sim[j]/pos_sub[i,j])
    #   = mean_{i,j} log(pos_sub) - mean_j log(pos_sim)
    # (both operands strictly positive, so the identity is exact up to rounding)
    loss_ref[0, 0] = jnp.mean(jnp.log(pos_sub)) - jnp.mean(jnp.log(pos_sim))


def discriminator2_forward(h_aug, h_pos, h_neg=None, s_bias1=None, s_bias2=None):
    """Pallas equivalent of Discriminator2.forward.  h_neg / biases are unused
    (exactly as in the PyTorch forward)."""
    del h_neg, s_bias1, s_bias2
    # NOTE: at production scale the highest-value change is batching several
    # (h_aug, h_pos) pairs per call (leading "parallel" grid axis / fusing with
    # the encoder) and keeping n_h a multiple of 128; the single-pair call
    # below matches the module's forward() signature.
    loss = pl.pallas_call(
        _disc2_kernel,
        out_shape=jax.ShapeDtypeStruct((1, 1), jnp.float32),
        # No grid: one invocation, whole arrays in VMEM (block == full array,
        # so the (8,128) tiling constraint does not apply).
        in_specs=[
            pl.BlockSpec(memory_space=pltpu.MemorySpace.VMEM),
            pl.BlockSpec(memory_space=pltpu.MemorySpace.VMEM),
        ],
        # Scalar result lands in SMEM: cheap scalar store, no masked VMEM vst.
        out_specs=pl.BlockSpec(memory_space=pltpu.MemorySpace.SMEM),
    )(h_aug, h_pos)
    return loss[0, 0]


# Deterministic "parameters" for the unused sub-modules (shapes from __init__),
# kept only so the module definition is faithfully represented.
def init_unused_params(n_h, key):
    k1, _ = jax.random.split(key)
    limit = jnp.sqrt(6.0 / (n_h + n_h))  # xavier_uniform for Bilinear(n_h, n_h, 1)
    return {
        "bilinear_w": jax.random.uniform(k1, (1, n_h, n_h), jnp.float32, -limit, limit),
        "bilinear_b": jnp.zeros((1,), jnp.float32),
        "bn_gamma": jnp.ones((n_h,), jnp.float32),
        "bn_beta": jnp.zeros((n_h,), jnp.float32),
    }
# TODO(synk): Bilinear / ELU / BatchNorm1d / Softmax are never invoked in the
# reference forward(), so they are initialized but intentionally not computed.


def _reference(h_aug, h_pos):
    aug_abs = jnp.linalg.norm(h_aug, axis=1)
    pos_abs = jnp.linalg.norm(h_pos, axis=1)
    sim = jnp.einsum("ik,jk->ij", h_aug, h_pos) / jnp.einsum("i,j->ij", aug_abs, pos_abs)
    sim = jnp.exp(sim / T)
    pos_sim = jnp.diagonal(sim)                          # (B,)
    pos_sub = sim.sum(axis=1)[:, None] - pos_sim[None]   # (B,B)
    return jnp.mean(-jnp.log(pos_sim[None] / pos_sub))


if __name__ == "__main__":
    key = jax.random.PRNGKey(0)
    k1, k2, k3, k4 = jax.random.split(key, 4)

    B, n_h = 8, 32
    h_aug = jax.random.normal(k1, (B, n_h), jnp.float32)
    h_pos = jax.random.normal(k2, (B, n_h), jnp.float32)
    h_neg = jax.random.normal(k3, (B, n_h), jnp.float32)  # unused by forward

    _ = init_unused_params(n_h, k4)

    loss = discriminator2_forward(h_aug, h_pos, h_neg)
    jax.block_until_ready(loss)

    ref = _reference(h_aug, h_pos)
    assert jnp.allclose(loss, ref, rtol=1e-5, atol=1e-5), (loss, ref)

    print("KERNEL_OK")
</pallas_src>

<mosaic_0001>
module attributes {stable_mosaic.version = 11 : i64} {
  func.func @_disc2_kernel(%arg0: memref<8x32xf32, #tpu.memory_space<vmem>>, %arg1: memref<8x32xf32, #tpu.memory_space<vmem>>, %arg2: memref<1x1xf32, #tpu.memory_space<smem>>) attributes {dimension_semantics = [], scalar_prefetch = 0 : i64, scratch_operands = 0 : i64, tpu.core_type = #tpu.core_type<tc>} {
    %c0 = arith.constant 0 : index
    %c0_0 = arith.constant 0 : index
    %0 = vector.load %arg0[%c0, %c0_0] : memref<8x32xf32, #tpu.memory_space<vmem>>, vector<8x32xf32>
    %c0_1 = arith.constant 0 : index
    %c0_2 = arith.constant 0 : index
    %1 = vector.load %arg1[%c0_1, %c0_2] : memref<8x32xf32, #tpu.memory_space<vmem>>, vector<8x32xf32>
    %2 = arith.mulf %0, %0 : vector<8x32xf32>
    %cst = arith.constant dense<0.000000e+00> : vector<8xf32>
    %3 = vector.multi_reduction <add>, %2, %cst [1] : vector<8x32xf32> to vector<8xf32>
    %4 = vector.shape_cast %3 : vector<8xf32> to vector<8x1xf32>
    %5 = math.rsqrt %4 : vector<8x1xf32>
    %6 = arith.mulf %1, %1 : vector<8x32xf32>
    %cst_3 = arith.constant dense<0.000000e+00> : vector<8xf32>
    %7 = vector.multi_reduction <add>, %6, %cst_3 [1] : vector<8x32xf32> to vector<8xf32>
    %8 = vector.shape_cast %7 : vector<8xf32> to vector<8x1xf32>
    %9 = math.rsqrt %8 : vector<8x1xf32>
    %cst_4 = arith.constant 2.000000e+00 : f32
    %10 = vector.broadcast %cst_4 : f32 to vector<8x1xf32>
    %11 = arith.mulf %5, %10 : vector<8x1xf32>
    %12 = vector.broadcast %11 : vector<8x1xf32> to vector<8x32xf32>
    %13 = arith.mulf %0, %12 : vector<8x32xf32>
    %14 = vector.broadcast %9 : vector<8x1xf32> to vector<8x32xf32>
    %15 = arith.mulf %1, %14 : vector<8x32xf32>
    %cst_5 = arith.constant dense<0.000000e+00> : vector<8x8xf32>
    %16 = tpu.matmul %13, %15, %cst_5 {dimension_numbers = #tpu.dot_dimension_numbers<[1], [1], [0], [0], [0, 0, 1, 0], [], []>} : vector<8x32xf32>, vector<8x32xf32>, vector<8x8xf32> -> vector<8x8xf32>
    %17 = math.exp %16 : vector<8x8xf32>
    %18 = arith.mulf %13, %15 : vector<8x32xf32>
    %cst_6 = arith.constant dense<0.000000e+00> : vector<8xf32>
    %19 = vector.multi_reduction <add>, %18, %cst_6 [1] : vector<8x32xf32> to vector<8xf32>
    %20 = vector.shape_cast %19 : vector<8xf32> to vector<8x1xf32>
    %21 = math.exp %20 : vector<8x1xf32>
    %cst_7 = arith.constant dense<0.000000e+00> : vector<8xf32>
    %22 = vector.multi_reduction <add>, %17, %cst_7 [1] : vector<8x8xf32> to vector<8xf32>
    %23 = vector.shape_cast %22 : vector<8xf32> to vector<8x1xf32>
    %24 = tpu.transpose %21, [1, 0] : vector<8x1xf32> -> vector<1x8xf32>
    %25 = vector.broadcast %23 : vector<8x1xf32> to vector<8x8xf32>
    %26 = vector.broadcast %24 : vector<1x8xf32> to vector<8x8xf32>
    %27 = arith.subf %25, %26 : vector<8x8xf32>
    %28 = math.log %27 : vector<8x8xf32>
    %29 = vector.shape_cast %28 : vector<8x8xf32> to vector<1x8x8xf32>
    %cst_8 = arith.constant dense<0.000000e+00> : vector<1xf32>
    %30 = vector.multi_reduction <add>, %29, %cst_8 [1, 2] : vector<1x8x8xf32> to vector<1xf32>
    %31 = vector.shape_cast %30 : vector<1xf32> to vector<1x1x1xf32>
    %32 = vector.extract %31[0, 0, 0] : f32 from vector<1x1x1xf32>
    %cst_9 = arith.constant 6.400000e+01 : f32
    %33 = arith.divf %32, %cst_9 : f32
    %34 = math.log %21 : vector<8x1xf32>
    %35 = vector.shape_cast %34 : vector<8x1xf32> to vector<1x8x1xf32>
    %cst_10 = arith.constant dense<0.000000e+00> : vector<1xf32>
    %36 = vector.multi_reduction <add>, %35, %cst_10 [1, 2] : vector<1x8x1xf32> to vector<1xf32>
    %37 = vector.shape_cast %36 : vector<1xf32> to vector<1x1x1xf32>
    %38 = vector.extract %37[0, 0, 0] : f32 from vector<1x1x1xf32>
    %cst_11 = arith.constant 8.000000e+00 : f32
    %39 = arith.divf %38, %cst_11 : f32
    %40 = arith.subf %33, %39 : f32
    %c0_12 = arith.constant 0 : index
    %c0_13 = arith.constant 0 : index
    %41 = memref.load %arg2[%c0_12, %c0_13] : memref<1x1xf32, #tpu.memory_space<smem>>
    memref.store %40, %arg2[%c0_12, %c0_13] : memref<1x1xf32, #tpu.memory_space<smem>>
    return
  }
}

</mosaic_0001>

<bundles_post_ra>
// kernel: tpu_custom_call.1
= control target key start
LH: loop header
LB: loop body
LE: loop exit
PB: predicated region body
PF: predicated region fallthrough
CT: control target
= control target key end

     0   :  { %7 = vsyncpa [#allocation3], 0  ;;  %s346_s0 = inlined_call_operand.hbm [shape: f32[8,32], index: 0, kind: input, shape index: {}]   ;;  %s347_s1 = inlined_call_operand.hbm [shape: f32[8,32], index: 1, kind: input, shape index: {}]   ;;  %s348_s2 = inlined_call_operand.hbm [shape: f32[1,1], index: 2, kind: output, shape index: {}]  }
   0x1   :  { %8 = vsyncpa [#allocation6], 0 }
   0x2   :  { %9 = vsyncpa [#allocation4], 0  ;;  %s310_s9 = smov [#allocation2]   ;;  %s311_s11 = smov [#allocation5]  }
   0x3   :  { %s16_s10 = sshll.u32 %s310_s9, 4  ;;  %s26_s12 = sshll.u32 %s311_s11, 4  ;;  %s17_s10 = int_to_ptr.vmem [resolvable:$true] %s16_s10  ;;  %s27_s12 = int_to_ptr.vmem [resolvable:$true] %s26_s12 }
   0x4   :  { %s264_s13 = scalar_lea.vmem %s17_s10, 128  ;;  %p269_p1 = scmp.lt.s32.totalorder %s17_s10, %s17_s10 }
   0x5   :  { %p265_p0 = scmp.ne.s32.totalorder %s17_s10, %s264_s13  ;;  %p270_p2 = scmp.lt.s32.totalorder %s264_s13, %s264_s13 }
   0x7   :  { %p271_p3 = por %p270_p2, %p269_p1 }
   0x9   :  { %p272_p4 = pnand %p271_p3, %p265_p0 }
   0xb   :  { %275 = shalt.err (!%p272_p4)
}
   0xc   :  { %19 = dma.hbm_to_vmem [thread:$0]  %s346_s0, 128, %s17_s10, [#allocation3]  }
   0xd   :  { %s284_s16 = scalar_lea.vmem %s27_s12, 128  ;;  %p289_p6 = scmp.lt.s32.totalorder %s27_s12, %s27_s12 }
   0xe   :  { %p285_p5 = scmp.ne.s32.totalorder %s27_s12, %s284_s16  ;;  %p290_p7 = scmp.lt.s32.totalorder %s284_s16, %s284_s16 }
  0x10   :  { %p291_p8 = por %p290_p7, %p289_p6 }
  0x12   :  { %p292_p9 = pnand %p291_p8, %p285_p5 }
  0x14   :  { %295 = shalt.err (!%p292_p9)
}
  0x15   :  { %29 = dma.hbm_to_vmem [thread:$0]  %s347_s1, 128, %s27_s12, [#allocation6]  }
  0x16   :  { %304 = dma.done.wait [#allocation3], 128  }
  0x17   :  { %305 = vsyncadd [#allocation3], 4294967168 }
  0x18   :  { %306 = dma.done.wait [#allocation6], 128  }
  0x19   :  { %307 = vsyncadd [#allocation6], 4294967168  ;;  %v37_v0 = vld [vmem:[#allocation5] sm:$0xff]  ;;  %vm39_vm0 = vcmask 261120   ;;  %v36_v1 = vld [vmem:[#allocation2] sm:$0xff]  ;;  %v312_v6 = vmov 0.0   ;;  %v172_v24 = vlaneseq }
  0x1a   :  { %v44_v2 = vmul.f32 %v37_v0, %v37_v0  ;;  %v38_v3 = vmul.f32 %v36_v1, %v36_v1  ;;  %230 = vmatprep.subr.mxu0 %v312_v6  ;;  %vm313_vm1 = vmmov 0   ;;  %vm136_vm2 = vcmask 64512   ;;  %s314_s22 = smov [#allocation7]  }
  0x1b   :  { %232 = vmatprep.mubr.msk.f32.mxu0 %vm313_vm1, %v312_v6  ;;  %v173_v25 = vshrl.u32 %v172_v24, 7  ;;  %vm194_vm3 = vcmask 7168  }
  0x1c   :  { %v45_v4 = vsel %vm39_vm0, %v44_v2, 0.0  ;;  %v40_v5 = vsel %vm39_vm0, %v38_v3, 0.0 }
  0x1d   :  { %46 = vadd.xlane.f32.xlu0 %v45_v4  ;;  %v174_v26 = vsub.s32 0, %v173_v25 }
  0x21   :  { %41 = vadd.xlane.f32.xlu0 %v40_v5 }
  0xa6   :  { %v47_v7 = vpop.xlane.xlu0 %46 }
  0xa7   :  { %244 = vrsqrt.f32 %v47_v7 }
  0xaa   :  { %v42_v8 = vpop.xlane.xlu0 %41 }
  0xab   :  { %246 = vrsqrt.f32 %v42_v8 }
  0xb4   :  { %v245_v9 = vpop.eup %244 }
  0xb5   :  { %v51_v10 = vmul.f32 %v245_v9, %v37_v0 }
  0xb7   :  { %231 = vmatpush3.xpose.msk.msra.mxu0 %vm39_vm0, %v51_v10 }
  0xb8   :  { %v247_v11 = vpop.eup %246 }
  0xb9   :  { %v49_v12 = vmul.f32 2.0, %v247_v11 }
  0xbb   :  { %v50_v13 = vmul.f32 %v49_v12, %v36_v1 }
  0xbd   :  { %233 = vmatmul.mubr.msk.f32.vlgmr.msra.gmra.mxu0 %vm39_vm0, %v50_v13  ;;  %v130_v14 = vmul.f32 %v51_v10, %v50_v13 }
  0xbf   :  { %v131_v15 = vsel %vm39_vm0, %v130_v14, 0.0 }
  0xc0   :  { %132 = vadd.xlane.f32.xlu1 %v131_v15 }
 0x149   :  { %v133_v16 = vpop.xlane.xlu1 %132 }
 0x14a   :  { %v134_v17 = vmul.f32 1.442695, %v133_v16 }
 0x14c   :  { %248 = vpow2.f32 %v134_v17 }
 0x159   :  { %v249_v18 = vpop.eup %248 }
 0x15a   :  { %140 = vxpose.xlu0.b32.start.end [1/1] (short) (narrow) %v249_v18, 8 }
 0x17d   :  { %v124_v19 = vpop.f32.mrf.mxu0 }
 0x17e   :  { %v128_v20 = vmul.f32 1.442695, %v124_v19 }
 0x17f   :  { %v234_v21 = vpop.f32.mrf.mxu0 }
 0x180   :  { %250 = vpow2.f32 %v128_v20 }
 0x181   :  { %252 = vlog2.f32 %v249_v18 }
 0x18d   :  { %v251_v22 = vpop.eup %250 }
 0x18e   :  { %v137_v23 = vsel %vm136_vm2, %v251_v22, 0.0  ;;  %v253_v31 = vpop.eup %252 }
 0x18f   :  { %138 = vadd.xlane.f32.xlu1 %v137_v23  ;;  %v193_v35 = vmul.f32 0.6931472, %v253_v31 }
 0x191   :  { %v195_v36 = vsel %vm194_vm3, %v193_v35, 0.0 }
 0x1d6   :  { %v156_v27 = vpop.trf.xlu0 }
 0x1d7   :  { %v175_v28 = vrot.slane %v156_v27, %v174_v26 }
 0x218   :  { %v139_v29 = vpop.xlane.xlu1 %138 }
 0x219   :  { %v176_v30 = vsub.f32 %v139_v29, %v175_v28 }
 0x21b   :  { %254 = vlog2.f32 %v176_v30 }
 0x228   :  { %v255_v32 = vpop.eup %254 }
 0x229   :  { %v178_v33 = vmul.f32 0.6931472, %v255_v32 }
 0x22b   :  { %v179_v34 = vsel %vm136_vm2, %v178_v33, 0.0 }
 0x22c   :  { %180 = vadd.xlane.f32.xlu1 %v179_v34 }
 0x230   :  { %196 = vadd.xlane.f32.xlu1 %v195_v36 }
 0x2b5   :  { %v181_v37 = vpop.xlane.xlu1 %180 }
 0x2b6   :  { %v182_v38 = vrot.slane %v181_v37, 4 }
 0x2b8   :  { %v183_v39 = vadd.f32 %v182_v38, %v181_v37 }
 0x2b9   :  { %v197_v40 = vpop.xlane.xlu1 %196 }
 0x2ba   :  { %v184_v41 = vrot.slane %v183_v39, 2  ;;  %v198_v42 = vrot.slane %v197_v40, 4 }
 0x2bc   :  { %v199_v43 = vadd.f32 %v198_v42, %v197_v40  ;;  %v185_v44 = vadd.f32 %v184_v41, %v183_v39 }
 0x2be   :  { %v200_v45 = vrot.slane %v199_v43, 2  ;;  %v186_v46 = vrot.slane %v185_v44, 1 }
 0x2c0   :  { %v201_v47 = vadd.f32 %v200_v45, %v199_v43  ;;  %v187_v48 = vadd.f32 %v186_v46, %v185_v44 }
 0x2c2   :  { %235 = vpush %v187_v48  ;;  %v202_v49 = vrot.slane %v201_v47, 1 }
 0x2c4   :  { %v203_v50 = vadd.f32 %v202_v49, %v201_v47 }
 0x2c6   :  { %237 = vpush %v203_v50 }
 0x2f3   :  { %s236_s0 = spop %235 }
 0x2f4   :  { %s191_s1 = smul.f32 0.015625, %s236_s0 }
 0x2f7   :  { %s238_s19 = spop %237 }
 0x2f8   :  { %s207_s20 = smul.f32 0.125, %s238_s19 }
 0x2fa   :  { %s208_s21 = ssub.f32 %s191_s1, %s207_s20 }
 0x2fc   :  { %210 = sst [smem:[#allocation7]] %s208_s21 }
 0x2fd   :  { %218 = dma.smem_to_hbm %s314_s22, 16, %s348_s2, [#allocation4]  }
 0x2fe   :  { %308 = dma.done.wait [#allocation4], 16  }
 0x2ff   :  { %309 = vsyncadd [#allocation4], 4294967280 }
 0x300   :  { %222 = sfence }
 0x301   :  { %223 = vsyncpa [#allocation3], 1 }
 0x302   :  { %224 = vsyncpa [#allocation6], 1 }
 0x303   :  { %225 = vsyncpa [#allocation4], 1 }

</bundles_post_ra>
